<compile_context>
chip_gen: v6e
topology: v6e:2x2x1
jax: 0.10.0
libtpu: 0.0.40
codegen_flags: <defaults>
</compile_context>

<pallas_src>
import functools
import math

import jax
import jax.numpy as jnp
from jax import lax
from jax.experimental import pallas as pl
from jax.experimental.pallas import tpu as pltpu


def _round_up(x, m):
    return ((x + m - 1) // m) * m


def _supcon_kernel(feat_q_ref, feat_k_ref, cls_q_ref, cls_k_ref, pos_cnt_ref,
                   out_ref, denom_acc, pos_sim_acc,
                   *, temp_over_base, n_valid, row_tile, col_tile, has_col_pad):
    i = pl.program_id(0)          # anchor (row) tile      -- "parallel"
    k = pl.program_id(1)          # contrast (column) tile -- streamed reduction
    n_col_tiles = pl.num_programs(1)

    @pl.when(k == 0)
    def _init():
        denom_acc[...] = jnp.zeros_like(denom_acc)
        pos_sim_acc[...] = jnp.zeros_like(pos_sim_acc)

    # Features arrive pre-normalized (F.normalize) with 1/sqrt(temperature)
    # folded in, as bf16.  MXU matmul contracting dim 1 of both operands
    # (no transpose); f32 accumulation => sim already carries 1/temperature.
    sim = lax.dot_general(feat_q_ref[...], feat_k_ref[...],
                          dimension_numbers=(((1,), (1,)), ((), ())),
                          preferred_element_type=jnp.float32)
    sim = jnp.clip(sim, -20.0, 20.0)                       # matches torch.clamp
    pos_mask = cls_q_ref[...] == cls_k_ref[...]            # (rt, ct) bool

    def _accumulate(exp_sim, pos_sim):
        denom_acc[...] += jnp.sum(exp_sim, axis=1, keepdims=True)
        pos_sim_acc[...] += jnp.sum(pos_sim, axis=1, keepdims=True)

    # A tile only needs mask work if it straddles the diagonal (self-pair
    # exclusion) or is the last column tile while padded columns exist.
    row_lo = i * row_tile
    col_lo = k * col_tile
    diag_overlap = jnp.logical_and(col_lo < row_lo + row_tile,
                                   row_lo < col_lo + col_tile)
    if has_col_pad:
        needs_mask = jnp.logical_or(diag_overlap, k == n_col_tiles - 1)
    else:
        needs_mask = diag_overlap

    @pl.when(jnp.logical_not(needs_mask))
    def _fast_path():                 # interior tiles: no iota / diag / validity
        _accumulate(jnp.exp(sim), jnp.where(pos_mask, sim, 0.0))

    @pl.when(needs_mask)
    def _masked_path():
        row_ids = row_lo + lax.broadcasted_iota(jnp.int32, (row_tile, 1), 0)
        col_ids = col_lo + lax.broadcasted_iota(jnp.int32, (1, col_tile), 1)
        keep = row_ids != col_ids
        if has_col_pad:
            keep = jnp.logical_and(keep, col_ids < n_valid)
        _accumulate(jnp.where(keep, jnp.exp(sim), 0.0),
                    jnp.where(jnp.logical_and(pos_mask, keep), sim, 0.0))

    @pl.when(k == n_col_tiles - 1)
    def _finalize():
        cnt = pos_cnt_ref[...]                              # (rt, 1) f32, from wrapper
        log_denom = jnp.log(denom_acc[...] + 1e-8)
        mean_lpp = (pos_sim_acc[...] - cnt * log_denom) / (cnt + 1e-8)
        loss_row = -temp_over_base * mean_lpp
        row_ids = row_lo + lax.broadcasted_iota(jnp.int32, (row_tile, 1), 0)
        out_ref[...] = jnp.where(row_ids < n_valid, loss_row, 0.0)


def _pick_tiles(n, d_pad):
    """Rectangular tiles, budgeted against v7x VMEM (64 MiB phys / 32 MiB scoped)."""
    col_tile = 256 if n >= 1024 else 128
    row_tile = 512 if n >= 2048 else (256 if n >= 512 else 128)

    def vmem_est(rt, ct):
        feat = 2 * (rt + ct) * d_pad * 2          # double-buffered bf16 feature blocks
        vecs = 12 * rt * 128 * 4                  # (rt,1) inputs/out/scratch (lane-padded)
        tmps = 6 * rt * ct * 4                    # (rt,ct) f32 temporaries
        return feat + vecs + tmps

    budget = 24 * 1024 * 1024
    while row_tile > 128 and vmem_est(row_tile, col_tile) > budget:
        row_tile //= 2
    while col_tile > 128 and vmem_est(row_tile, col_tile) > budget:
        col_tile //= 2
    return row_tile, col_tile, vmem_est(row_tile, col_tile)


def supcon_loss(features, labels=None, mask=None, temperature=0.07,
                contrast_mode="all", base_temperature=0.07):
    """JAX/Pallas equivalent of SupConLoss.forward (contrast_mode='all')."""
    if features.ndim < 3:
        raise ValueError("`features` needs to be [batch_size, n_views, ...]")
    if features.ndim > 3:
        features = features.reshape(features.shape[0], features.shape[1], -1)
    if contrast_mode != "all":
        # TODO(synk): contrast_mode='one' (anchor = first view only) not implemented.
        raise ValueError("only contrast_mode='all' is implemented")

    B, V, D = features.shape
    N = B * V

    if labels is not None and mask is not None:
        raise ValueError("Cannot specify both `labels` and `mask`")
    if mask is not None:
        # TODO(synk): arbitrary [B,B] mask (non class-equality) not supported by the tiled kernel.
        raise NotImplementedError("custom `mask` not supported by the Pallas kernel")
    if labels is not None:
        labels = jnp.asarray(labels).reshape(-1)
        if labels.shape[0] != B:
            raise ValueError("Number of labels does not match number of features")
        cls_b = labels.astype(jnp.int32)
    else:
        cls_b = jnp.arange(B, dtype=jnp.int32)   # eye mask == distinct classes

    # contrast order = torch.cat(torch.unbind(features, 1), 0)  (view-major)
    cls_full = jnp.tile(cls_b, V)                                         # [N]

    # Normalize ONCE in the wrapper; fold 1/sqrt(temperature) into both sides;
    # ship bf16 so the MXU runs bf16 matmuls and HBM traffic is halved.
    inv_sqrt_temp = jnp.float32(1.0 / math.sqrt(temperature))
    f = features.astype(jnp.float32)
    nrm = jnp.sqrt(jnp.sum(f * f, axis=2, keepdims=True))
    f = (f / jnp.maximum(nrm, 1e-8)) * inv_sqrt_temp
    feats = jnp.transpose(f, (1, 0, 2)).reshape(N, D).astype(jnp.bfloat16)

    # Positives per anchor row = (#same-class samples in batch)*V - 1  (O(B^2), tiny).
    counts_b = jnp.sum((cls_b[:, None] == cls_b[None, :]).astype(jnp.int32), axis=1)
    pos_cnt_full = jnp.tile(counts_b * V - 1, V).astype(jnp.float32)      # [N]

    d_pad = max(_round_up(D, 128), 128)
    row_tile, col_tile, vmem_est = _pick_tiles(N, d_pad)
    n_pad = _round_up(N, max(row_tile, col_tile))
    has_col_pad = (n_pad != N)

    feats = jnp.pad(feats, ((0, n_pad - N), (0, d_pad - D)))
    cls_row = jnp.pad(cls_full, (0, n_pad - N)).reshape(n_pad, 1)
    cls_col = cls_row.reshape(1, n_pad)
    pos_cnt = jnp.pad(pos_cnt_full, (0, n_pad - N)).reshape(n_pad, 1)

    grid_rows = n_pad // row_tile
    grid = (grid_rows, n_pad // col_tile)

    kernel = functools.partial(
        _supcon_kernel,
        temp_over_base=float(temperature / base_temperature),
        n_valid=int(N),
        row_tile=int(row_tile),
        col_tile=int(col_tile),
        has_col_pad=bool(has_col_pad),
    )

    vmem_limit = int(min(48 * 1024 * 1024, max(16 * 1024 * 1024, 2 * vmem_est)))

    cost = pl.CostEstimate(
        flops=2 * n_pad * n_pad * d_pad,
        transcendentals=n_pad * n_pad + n_pad,
        # q-side streamed once, k-side once per row tile, bf16; thin per-row vectors in f32.
        bytes_accessed=2 * n_pad * d_pad * (1 + grid_rows) + 4 * 4 * n_pad,
    )

    per_row = pl.pallas_call(
        kernel,
        out_shape=jax.ShapeDtypeStruct((n_pad, 1), jnp.float32),
        grid_spec=pltpu.PrefetchScalarGridSpec(
            num_scalar_prefetch=0,
            grid=grid,
            in_specs=[
                pl.BlockSpec((row_tile, d_pad), lambda i, k: (i, 0)),  # anchor rows (bf16)
                pl.BlockSpec((col_tile, d_pad), lambda i, k: (k, 0)),  # contrast cols (bf16)
                pl.BlockSpec((row_tile, 1), lambda i, k: (i, 0)),      # row class ids
                pl.BlockSpec((1, col_tile), lambda i, k: (0, k)),      # col class ids
                pl.BlockSpec((row_tile, 1), lambda i, k: (i, 0)),      # positives per row
            ],
            out_specs=pl.BlockSpec((row_tile, 1), lambda i, k: (i, 0)),
            scratch_shapes=[pltpu.VMEM((row_tile, 1), jnp.float32)] * 2,
        ),
        compiler_params=pltpu.CompilerParams(
            dimension_semantics=("parallel", "arbitrary"),
            vmem_limit_bytes=vmem_limit,
        ),
        cost_estimate=cost,
    )(feats, feats, cls_row, cls_col, pos_cnt)

    return jnp.sum(per_row) / jnp.float32(N)


def _supcon_loss_ref(features, labels=None, temperature=0.07, base_temperature=0.07):
    """Pure-JAX f32 reference, faithful to the PyTorch SupConLoss (contrast_mode='all')."""
    B, V, D = features.shape
    N = B * V
    f = features.astype(jnp.float32)
    norm = jnp.sqrt(jnp.sum(f * f, axis=2, keepdims=True))
    f = f / jnp.maximum(norm, 1e-8)
    cf = jnp.transpose(f, (1, 0, 2)).reshape(N, D)
    sim = jnp.clip(cf @ cf.T / temperature, -20.0, 20.0)
    if labels is None:
        base_mask = jnp.eye(B, dtype=jnp.float32)
    else:
        lab = jnp.asarray(labels).reshape(-1, 1)
        base_mask = (lab == lab.T).astype(jnp.float32)
    m = jnp.tile(base_mask, (V, V))
    logits_mask = 1.0 - jnp.eye(N, dtype=jnp.float32)
    m = m * logits_mask
    exp_sim = jnp.exp(sim) * logits_mask
    log_prob = sim - jnp.log(jnp.sum(exp_sim, axis=1, keepdims=True) + 1e-8)
    mlpp = jnp.sum(m * log_prob, axis=1) / (jnp.sum(m, axis=1) + 1e-8)
    return jnp.mean(-(temperature / base_temperature) * mlpp)


if __name__ == "__main__":
    key = jax.random.PRNGKey(0)
    B, V, D = 8, 2, 32
    kf, kl = jax.random.split(key)
    features = jax.random.normal(kf, (B, V, D), dtype=jnp.float32)
    labels = jax.random.randint(kl, (B,), 0, 4)

    # Tolerances loosened vs. the all-f32 kernel because the matmul now runs on
    # bf16 feature blocks (f32 accumulation); expected loss error ~1e-2 absolute.

    # default (eye-mask / SimCLR-style) path
    loss = jax.block_until_ready(supcon_loss(features))
    ref = jax.block_until_ready(_supcon_loss_ref(features))
    assert jnp.allclose(loss, ref, atol=5e-2, rtol=2e-2), (loss, ref)

    # supervised (labels) path
    loss_l = jax.block_until_ready(supcon_loss(features, labels=labels))
    ref_l = jax.block_until_ready(_supcon_loss_ref(features, labels=labels))
    assert jnp.allclose(loss_l, ref_l, atol=5e-2, rtol=2e-2), (loss_l, ref_l)

    print("KERNEL_OK")
</pallas_src>

<mosaic_0001>
module attributes {stable_mosaic.version = 11 : i64} {
  func.func @_supcon_kernel(%arg0: i32, %arg1: i32, %arg2: memref<128x128xbf16, #tpu.memory_space<vmem>>, %arg3: memref<128x128xbf16, #tpu.memory_space<vmem>>, %arg4: memref<128x1xi32, #tpu.memory_space<vmem>>, %arg5: memref<1x128xi32, #tpu.memory_space<vmem>>, %arg6: memref<128x1xf32, #tpu.memory_space<vmem>>, %arg7: memref<128x1xf32, #tpu.memory_space<vmem>>, %arg8: memref<128x1xf32, #tpu.memory_space<vmem>>, %arg9: memref<128x1xf32, #tpu.memory_space<vmem>>) attributes {dimension_semantics = [#tpu.dimension_semantics<parallel>, #tpu.dimension_semantics<arbitrary>], iteration_bounds = array<i64: 1, 1>, scalar_prefetch = 0 : i64, scratch_operands = 2 : i64, tpu.core_type = #tpu.core_type<tc>, window_params = [{transform_indices = @transform_0, window_bounds = array<i64: 128, 128>}, {transform_indices = @transform_1, window_bounds = array<i64: 128, 128>}, {transform_indices = @transform_2, window_bounds = array<i64: 128, 1>}, {transform_indices = @transform_3, window_bounds = array<i64: 1, 128>}, {transform_indices = @transform_4, window_bounds = array<i64: 128, 1>}, {transform_indices = @transform_5, window_bounds = array<i64: 128, 1>}]} {
    %c0_i32 = arith.constant 0 : i32
    %0 = arith.cmpi eq, %arg1, %c0_i32 : i32
    %1 = arith.extui %0 : i1 to i32
    %c0_i32_0 = arith.constant 0 : i32
    %2 = arith.cmpi ne, %1, %c0_i32_0 : i32
    scf.if %2 {
      %cst_18 = arith.constant 0.000000e+00 : f32
      %32 = vector.broadcast %cst_18 : f32 to vector<128x1xf32>
      %c0_19 = arith.constant 0 : index
      %c0_20 = arith.constant 0 : index
      %33 = vector.load %arg8[%c0_19, %c0_20] : memref<128x1xf32, #tpu.memory_space<vmem>>, vector<128x1xf32>
      tpu.vector_store %arg8[%c0_19, %c0_20], %32 {strides = array<i32>} : memref<128x1xf32, #tpu.memory_space<vmem>>, vector<128x1xf32>,
      %cst_21 = arith.constant 0.000000e+00 : f32
      %34 = vector.broadcast %cst_21 : f32 to vector<128x1xf32>
      %c0_22 = arith.constant 0 : index
      %c0_23 = arith.constant 0 : index
      %35 = vector.load %arg9[%c0_22, %c0_23] : memref<128x1xf32, #tpu.memory_space<vmem>>, vector<128x1xf32>
      tpu.vector_store %arg9[%c0_22, %c0_23], %34 {strides = array<i32>} : memref<128x1xf32, #tpu.memory_space<vmem>>, vector<128x1xf32>,
    } else {
    }
    %c0 = arith.constant 0 : index
    %c0_1 = arith.constant 0 : index
    %3 = vector.load %arg2[%c0, %c0_1] : memref<128x128xbf16, #tpu.memory_space<vmem>>, vector<128x128xbf16>
    %c0_2 = arith.constant 0 : index
    %c0_3 = arith.constant 0 : index
    %4 = vector.load %arg3[%c0_2, %c0_3] : memref<128x128xbf16, #tpu.memory_space<vmem>>, vector<128x128xbf16>
    %cst = arith.constant dense<0.000000e+00> : vector<128x128xf32>
    %5 = tpu.matmul %3, %4, %cst {dimension_numbers = #tpu.dot_dimension_numbers<[1], [1], [0], [0], [0, 0, 1, 0], [], []>} : vector<128x128xbf16>, vector<128x128xbf16>, vector<128x128xf32> -> vector<128x128xf32>
    %cst_4 = arith.constant -2.000000e+01 : f32
    %cst_5 = arith.constant 2.000000e+01 : f32
    %6 = vector.broadcast %cst_4 : f32 to vector<128x128xf32>
    %7 = arith.maximumf %6, %5 : vector<128x128xf32>
    %8 = vector.broadcast %cst_5 : f32 to vector<128x128xf32>
    %9 = arith.minimumf %8, %7 : vector<128x128xf32>
    %c0_6 = arith.constant 0 : index
    %c0_7 = arith.constant 0 : index
    %10 = vector.load %arg4[%c0_6, %c0_7] : memref<128x1xi32, #tpu.memory_space<vmem>>, vector<128x1xi32>
    %c0_8 = arith.constant 0 : index
    %c0_9 = arith.constant 0 : index
    %11 = vector.load %arg5[%c0_8, %c0_9] : memref<1x128xi32, #tpu.memory_space<vmem>>, vector<1x128xi32>
    %12 = vector.broadcast %10 : vector<128x1xi32> to vector<128x128xi32>
    %13 = vector.broadcast %11 : vector<1x128xi32> to vector<128x128xi32>
    %14 = arith.cmpi eq, %12, %13 : vector<128x128xi32>
    %c128_i32 = arith.constant 128 : i32
    %15 = arith.muli %arg0, %c128_i32 : i32
    %c128_i32_10 = arith.constant 128 : i32
    %16 = arith.muli %arg1, %c128_i32_10 : i32
    %c128_i32_11 = arith.constant 128 : i32
    %17 = arith.addi %15, %c128_i32_11 : i32
    %18 = arith.cmpi slt, %16, %17 : i32
    %c128_i32_12 = arith.constant 128 : i32
    %19 = arith.addi %16, %c128_i32_12 : i32
    %20 = arith.cmpi slt, %15, %19 : i32
    %21 = arith.andi %18, %20 : i1
    %c0_i32_13 = arith.constant 0 : i32
    %22 = arith.cmpi eq, %arg1, %c0_i32_13 : i32
    %23 = arith.ori %21, %22 : i1
    %true = arith.constant true
    %24 = arith.xori %23, %true : i1
    %25 = arith.extui %24 : i1 to i32
    %c0_i32_14 = arith.constant 0 : i32
    %26 = arith.cmpi ne, %25, %c0_i32_14 : i32
    scf.if %26 {
      %32 = math.exp %9 : vector<128x128xf32>
      %cst_18 = arith.constant 0.000000e+00 : f32
      %33 = vector.broadcast %cst_18 : f32 to vector<128x128xf32>
      %34 = arith.select %14, %9, %33 : vector<128x128xi1>, vector<128x128xf32>
      %c0_19 = arith.constant 0 : index
      %c0_20 = arith.constant 0 : index
      %35 = vector.load %arg8[%c0_19, %c0_20] : memref<128x1xf32, #tpu.memory_space<vmem>>, vector<128x1xf32>
      %cst_21 = arith.constant dense<0.000000e+00> : vector<128xf32>
      %36 = vector.multi_reduction <add>, %32, %cst_21 [1] : vector<128x128xf32> to vector<128xf32>
      %37 = vector.shape_cast %36 : vector<128xf32> to vector<128x1xf32>
      %38 = arith.addf %35, %37 : vector<128x1xf32>
      %c0_22 = arith.constant 0 : index
      %c0_23 = arith.constant 0 : index
      %39 = vector.load %arg8[%c0_22, %c0_23] : memref<128x1xf32, #tpu.memory_space<vmem>>, vector<128x1xf32>
      tpu.vector_store %arg8[%c0_22, %c0_23], %38 {strides = array<i32>} : memref<128x1xf32, #tpu.memory_space<vmem>>, vector<128x1xf32>,
      %c0_24 = arith.constant 0 : index
      %c0_25 = arith.constant 0 : index
      %40 = vector.load %arg9[%c0_24, %c0_25] : memref<128x1xf32, #tpu.memory_space<vmem>>, vector<128x1xf32>
      %cst_26 = arith.constant dense<0.000000e+00> : vector<128xf32>
      %41 = vector.multi_reduction <add>, %34, %cst_26 [1] : vector<128x128xf32> to vector<128xf32>
      %42 = vector.shape_cast %41 : vector<128xf32> to vector<128x1xf32>
      %43 = arith.addf %40, %42 : vector<128x1xf32>
      %c0_27 = arith.constant 0 : index
      %c0_28 = arith.constant 0 : index
      %44 = vector.load %arg9[%c0_27, %c0_28] : memref<128x1xf32, #tpu.memory_space<vmem>>, vector<128x1xf32>
      tpu.vector_store %arg9[%c0_27, %c0_28], %43 {strides = array<i32>} : memref<128x1xf32, #tpu.memory_space<vmem>>, vector<128x1xf32>,
    } else {
    }
    %27 = arith.extui %23 : i1 to i32
    %c0_i32_15 = arith.constant 0 : i32
    %28 = arith.cmpi ne, %27, %c0_i32_15 : i32
    scf.if %28 {
      %32 = tpu.iota {dimensions = array<i32: 0>} : vector<128x1xi32>
      %33 = vector.broadcast %15 : i32 to vector<128x1xi32>
      %34 = arith.addi %33, %32 : vector<128x1xi32>
      %35 = tpu.iota {dimensions = array<i32: 1>} : vector<1x128xi32>
      %36 = vector.broadcast %16 : i32 to vector<1x128xi32>
      %37 = arith.addi %36, %35 : vector<1x128xi32>
      %38 = vector.broadcast %34 : vector<128x1xi32> to vector<128x128xi32>
      %39 = vector.broadcast %37 : vector<1x128xi32> to vector<128x128xi32>
      %40 = arith.cmpi ne, %38, %39 : vector<128x128xi32>
      %c16_i32 = arith.constant 16 : i32
      %41 = vector.broadcast %c16_i32 : i32 to vector<1x128xi32>
      %42 = arith.cmpi slt, %37, %41 : vector<1x128xi32>
      %43 = vector.broadcast %42 : vector<1x128xi1> to vector<128x128xi1>
      %44 = arith.andi %40, %43 : vector<128x128xi1>
      %45 = math.exp %9 : vector<128x128xf32>
      %cst_18 = arith.constant 0.000000e+00 : f32
      %46 = vector.broadcast %cst_18 : f32 to vector<128x128xf32>
      %47 = arith.select %44, %45, %46 : vector<128x128xi1>, vector<128x128xf32>
      %48 = arith.andi %14, %44 : vector<128x128xi1>
      %cst_19 = arith.constant 0.000000e+00 : f32
      %49 = vector.broadcast %cst_19 : f32 to vector<128x128xf32>
      %50 = arith.select %48, %9, %49 : vector<128x128xi1>, vector<128x128xf32>
      %c0_20 = arith.constant 0 : index
      %c0_21 = arith.constant 0 : index
      %51 = vector.load %arg8[%c0_20, %c0_21] : memref<128x1xf32, #tpu.memory_space<vmem>>, vector<128x1xf32>
      %cst_22 = arith.constant dense<0.000000e+00> : vector<128xf32>
      %52 = vector.multi_reduction <add>, %47, %cst_22 [1] : vector<128x128xf32> to vector<128xf32>
      %53 = vector.shape_cast %52 : vector<128xf32> to vector<128x1xf32>
      %54 = arith.addf %51, %53 : vector<128x1xf32>
      %c0_23 = arith.constant 0 : index
      %c0_24 = arith.constant 0 : index
      %55 = vector.load %arg8[%c0_23, %c0_24] : memref<128x1xf32, #tpu.memory_space<vmem>>, vector<128x1xf32>
      tpu.vector_store %arg8[%c0_23, %c0_24], %54 {strides = array<i32>} : memref<128x1xf32, #tpu.memory_space<vmem>>, vector<128x1xf32>,
      %c0_25 = arith.constant 0 : index
      %c0_26 = arith.constant 0 : index
      %56 = vector.load %arg9[%c0_25, %c0_26] : memref<128x1xf32, #tpu.memory_space<vmem>>, vector<128x1xf32>
      %cst_27 = arith.constant dense<0.000000e+00> : vector<128xf32>
      %57 = vector.multi_reduction <add>, %50, %cst_27 [1] : vector<128x128xf32> to vector<128xf32>
      %58 = vector.shape_cast %57 : vector<128xf32> to vector<128x1xf32>
      %59 = arith.addf %56, %58 : vector<128x1xf32>
      %c0_28 = arith.constant 0 : index
      %c0_29 = arith.constant 0 : index
      %60 = vector.load %arg9[%c0_28, %c0_29] : memref<128x1xf32, #tpu.memory_space<vmem>>, vector<128x1xf32>
      tpu.vector_store %arg9[%c0_28, %c0_29], %59 {strides = array<i32>} : memref<128x1xf32, #tpu.memory_space<vmem>>, vector<128x1xf32>,
    } else {
    }
    %c0_i32_16 = arith.constant 0 : i32
    %29 = arith.cmpi eq, %arg1, %c0_i32_16 : i32
    %30 = arith.extui %29 : i1 to i32
    %c0_i32_17 = arith.constant 0 : i32
    %31 = arith.cmpi ne, %30, %c0_i32_17 : i32
    scf.if %31 {
      %c0_18 = arith.constant 0 : index
      %c0_19 = arith.constant 0 : index
      %32 = vector.load %arg6[%c0_18, %c0_19] : memref<128x1xf32, #tpu.memory_space<vmem>>, vector<128x1xf32>
      %c0_20 = arith.constant 0 : index
      %c0_21 = arith.constant 0 : index
      %33 = vector.load %arg8[%c0_20, %c0_21] : memref<128x1xf32, #tpu.memory_space<vmem>>, vector<128x1xf32>
      %cst_22 = arith.constant 9.99999993E-9 : f32
      %34 = vector.broadcast %cst_22 : f32 to vector<128x1xf32>
      %35 = arith.addf %33, %34 : vector<128x1xf32>
      %36 = math.log %35 : vector<128x1xf32>
      %c0_23 = arith.constant 0 : index
      %c0_24 = arith.constant 0 : index
      %37 = vector.load %arg9[%c0_23, %c0_24] : memref<128x1xf32, #tpu.memory_space<vmem>>, vector<128x1xf32>
      %38 = arith.mulf %32, %36 : vector<128x1xf32>
      %39 = arith.subf %37, %38 : vector<128x1xf32>
      %cst_25 = arith.constant 9.99999993E-9 : f32
      %40 = vector.broadcast %cst_25 : f32 to vector<128x1xf32>
      %41 = arith.addf %32, %40 : vector<128x1xf32>
      %42 = arith.divf %39, %41 : vector<128x1xf32>
      %cst_26 = arith.constant -1.000000e+00 : f32
      %43 = vector.broadcast %cst_26 : f32 to vector<128x1xf32>
      %44 = arith.mulf %43, %42 : vector<128x1xf32>
      %45 = tpu.iota {dimensions = array<i32: 0>} : vector<128x1xi32>
      %46 = vector.broadcast %15 : i32 to vector<128x1xi32>
      %47 = arith.addi %46, %45 : vector<128x1xi32>
      %c16_i32 = arith.constant 16 : i32
      %48 = vector.broadcast %c16_i32 : i32 to vector<128x1xi32>
      %49 = arith.cmpi slt, %47, %48 : vector<128x1xi32>
      %cst_27 = arith.constant 0.000000e+00 : f32
      %50 = vector.broadcast %cst_27 : f32 to vector<128x1xf32>
      %51 = arith.select %49, %44, %50 : vector<128x1xi1>, vector<128x1xf32>
      %c0_28 = arith.constant 0 : index
      %c0_29 = arith.constant 0 : index
      %52 = vector.load %arg7[%c0_28, %c0_29] : memref<128x1xf32, #tpu.memory_space<vmem>>, vector<128x1xf32>
      tpu.vector_store %arg7[%c0_28, %c0_29], %51 {strides = array<i32>} : memref<128x1xf32, #tpu.memory_space<vmem>>, vector<128x1xf32>,
    } else {
    }
    return
  }
  func.func @transform_0(%arg0: i32, %arg1: i32) -> (i32, i32) {
    %c0_i32 = arith.constant 0 : i32
    %c0_i32_0 = arith.constant 0 : i32
    return %arg0, %c0_i32 : i32, i32
  }
  func.func @transform_1(%arg0: i32, %arg1: i32) -> (i32, i32) {
    %c0_i32 = arith.constant 0 : i32
    %c0_i32_0 = arith.constant 0 : i32
    return %arg1, %c0_i32 : i32, i32
  }
  func.func @transform_2(%arg0: i32, %arg1: i32) -> (i32, i32) {
    %c0_i32 = arith.constant 0 : i32
    %c0_i32_0 = arith.constant 0 : i32
    return %arg0, %c0_i32 : i32, i32
  }
  func.func @transform_3(%arg0: i32, %arg1: i32) -> (i32, i32) {
    %c0_i32 = arith.constant 0 : i32
    %c0_i32_0 = arith.constant 0 : i32
    return %c0_i32, %arg1 : i32, i32
  }
  func.func @transform_4(%arg0: i32, %arg1: i32) -> (i32, i32) {
    %c0_i32 = arith.constant 0 : i32
    %c0_i32_0 = arith.constant 0 : i32
    return %arg0, %c0_i32 : i32, i32
  }
  func.func @transform_5(%arg0: i32, %arg1: i32) -> (i32, i32) {
    %c0_i32 = arith.constant 0 : i32
    %c0_i32_0 = arith.constant 0 : i32
    return %arg0, %c0_i32 : i32, i32
  }
}

</mosaic_0001>

<bundles_post_ra>
// kernel: tpu_custom_call.1
= control target key start
LH: loop header
LB: loop body
LE: loop exit
PB: predicated region body
PF: predicated region fallthrough
CT: control target
= control target key end

     0   :  { %v1377_v1 = vmov 0   ;;  %vm2000_vm0 = vcmask 7168   ;;  %v1378_v33 = vmov 0.0   ;;  %v412_v34 = vlaneseq  ;;  %s1994_s1 = inlined_call_operand.vmem [shape: bf16[128,128], index: 1, kind: input, shape index: {}]   ;;  %s1995_s0 = inlined_call_operand.vmem [shape: bf16[128,128], index: 0, kind: input, shape index: {}]   ;;  %s1996_s2 = inlined_call_operand.vmem [shape: s32[128,1], index: 2, kind: input, shape index: {}]   ;;  %s1997_s3 = inlined_call_operand.vmem [shape: s32[1,128], index: 3, kind: input, shape index: {}]   ;;  %s1998_s5 = inlined_call_operand.vmem [shape: f32[128,1], index: 5, kind: output, shape index: {}]   ;;  %s1999_s4 = inlined_call_operand.vmem [shape: f32[128,1], index: 4, kind: input, shape index: {}]  }
   0x1   :  { %v1321_v0 = vld [vmem:[%s1994_s1 + $0x38] sm:$0xff]   ;;  %1320 = vset.pattern.permute.xlu1 %v1377_v1  ;;  %1319 = vset.pattern.permute.xlu0 %v1377_v1  ;;  %v1322_v2 = vld [vmem:[%s1994_s1 + $0x30] sm:$0xff]   ;;  %v1323_v3 = vld [vmem:[%s1994_s1 + $0x28] sm:$0xff]   ;;  %44 = vst.msk [vmem:[#allocation3 + $0x10] sm:$0xff] %vm2000_vm0, %v1378_v33 }
   0x2   :  { %1269 = vmatprep.subr.bf16.mxu0 %v1321_v0  ;;  %1301 = vmatprep.subr.bf16.mxu1 %v1321_v0  ;;  %v1329_v4 = vld [vmem:[%s1995_s0] sm:$0xff]   ;;  %v317_v7 = vld [vmem:[%s1996_s2 + $0x10] sm:$0xff]  ;;  %v318_v9 = vld [vmem:[%s1996_s2 + $0x18] sm:$0xff]  ;;  %26 = vst.msk [vmem:[#allocation2] sm:$0xff] %vm2000_vm0, %v1378_v33  ;;  %v1569_v35 = vshrl.u32 %v412_v34, 7  ;;  %v1572_v37 = vand.u32 127, %v412_v34 }
   0x3   :  { %1270 = vmatpush3.bf16.xpose.msra.mxu0 %v1321_v0  ;;  %1309 = vmatpush3.bf16.xpose.msra.mxu1 %v1321_v0  ;;  %v1330_v5 = vld [vmem:[%s1995_s0 + $0x20] sm:$0xff]   ;;  %v316_v10 = vld [vmem:[%s1996_s2 + $0x8] sm:$0xff]  ;;  %v1325_v13 = vld [vmem:[%s1994_s1 + $0x18] sm:$0xff]   ;;  %27 = vst.msk [vmem:[#allocation2 + $0x8] sm:$0xff] %vm2000_vm0, %v1378_v33 }
   0x4   :  { %1271 = vmatprep.subr.bf16.mxu0 %v1322_v2  ;;  %1302 = vmatprep.subr.bf16.mxu1 %v1322_v2  ;;  %v1324_v6 = vld [vmem:[%s1994_s1 + $0x20] sm:$0xff]   ;;  %v320_v11 = vld [vmem:[%s1996_s2 + $0x28] sm:$0xff]  ;;  %v322_v14 = vld [vmem:[%s1996_s2 + $0x38] sm:$0xff]  ;;  %28 = vst.msk [vmem:[#allocation2 + $0x10] sm:$0xff] %vm2000_vm0, %v1378_v33  ;;  %v415_v36 = vadd.s32 16, %v1569_v35  ;;  %vm466_vm2 = vcmp.lt.s32.totalorder %v1572_v37, 16  ;;  %vm450_vm3 = vcmp.ne.s32.totalorder %v1569_v35, %v1572_v37 }
   0x5   :  { %1285 = vmatprep.mubr.bf16.mxu0 %v1329_v4  ;;  %1293 = vmatprep.mubr.bf16.mxu1 %v1330_v5  ;;  %v315_v8 = vld [vmem:[%s1996_s2] sm:$0xff]  ;;  %v321_v15 = vld [vmem:[%s1996_s2 + $0x30] sm:$0xff]  ;;  %v324_v16 = vld [vmem:[%s1996_s2 + $0x48] sm:$0xff]  ;;  %29 = vst.msk [vmem:[#allocation2 + $0x18] sm:$0xff] %vm2000_vm0, %v1378_v33  ;;  %v416_v42 = vadd.s32 24, %v1569_v35  ;;  %v414_v48 = vadd.s32 8, %v1569_v35 }
   0x6   :  { %339 = vperm.xlu1 %1320, %v317_v7   ;;  %333 = vperm.xlu0 %1319, %v315_v8   ;;  %v319_v12 = vld [vmem:[%s1996_s2 + $0x20] sm:$0xff]  ;;  %v1326_v18 = vld [vmem:[%s1994_s1 + $0x10] sm:$0xff]   ;;  %v326_v19 = vld [vmem:[%s1996_s2 + $0x58] sm:$0xff]  ;;  %30 = vst.msk [vmem:[#allocation2 + $0x20] sm:$0xff] %vm2000_vm0, %v1378_v33  ;;  %vm452_vm1 = vcmp.ne.s32.totalorder %v415_v36, %v1572_v37  ;;  %v417_v51 = vadd.s32 32, %v1569_v35  ;;  %v418_v58 = vadd.s32 40, %v1569_v35 }
   0x7   :  { %v323_v17 = vld [vmem:[%s1996_s2 + $0x40] sm:$0xff]  ;;  %v325_v20 = vld [vmem:[%s1996_s2 + $0x50] sm:$0xff]  ;;  %v328_v21 = vld [vmem:[%s1996_s2 + $0x68] sm:$0xff]  ;;  %31 = vst.msk [vmem:[#allocation2 + $0x28] sm:$0xff] %vm2000_vm0, %v1378_v33  ;;  %vm453_vm10 = vcmp.ne.s32.totalorder %v416_v42, %v1572_v37  ;;  %vm451_vm11 = vcmp.ne.s32.totalorder %v414_v48, %v1572_v37  ;;  %v420_v41 = vadd.s32 56, %v1569_v35  ;;  %v422_v45 = vadd.s32 72, %v1569_v35 }
   0x8   :  { %v327_v22 = vld [vmem:[%s1996_s2 + $0x60] sm:$0xff]  ;;  %v1327_v23 = vld [vmem:[%s1994_s1 + $0x8] sm:$0xff]   ;;  %v330_v24 = vld [vmem:[%s1996_s2 + $0x78] sm:$0xff]  ;;  %32 = vst.msk [vmem:[#allocation2 + $0x30] sm:$0xff] %vm2000_vm0, %v1378_v33  ;;  %vm454_vm14 = vcmp.ne.s32.totalorder %v417_v51, %v1572_v37 }
   0x9   :  { %v329_v25 = vld [vmem:[%s1996_s2 + $0x70] sm:$0xff]  ;;  %v1328_v26 = vld [vmem:[%s1994_s1] sm:$0xff]   ;;  %v1331_v27 = vld [vmem:[%s1995_s0 + $0x8] sm:$0xff]   ;;  %33 = vst.msk [vmem:[#allocation2 + $0x38] sm:$0xff] %vm2000_vm0, %v1378_v33 }
   0xa   :  { %342 = vperm.xlu1 %1320, %v318_v9   ;;  %336 = vperm.xlu0 %1319, %v316_v10   ;;  %v1332_v28 = vld [vmem:[%s1995_s0 + $0x28] sm:$0xff]   ;;  %v1333_v29 = vld [vmem:[%s1995_s0 + $0x10] sm:$0xff]   ;;  %v1335_v31 = vld [vmem:[%s1995_s0 + $0x18] sm:$0xff]   ;;  %34 = vst.msk [vmem:[#allocation2 + $0x40] sm:$0xff] %vm2000_vm0, %v1378_v33 }
   0xb   :  { %1272 = vmatpush3.bf16.xpose.msra.mxu0 %v1322_v2  ;;  %1310 = vmatpush3.bf16.xpose.msra.mxu1 %v1322_v2  ;;  %v1334_v30 = vld [vmem:[%s1995_s0 + $0x30] sm:$0xff]   ;;  %v1336_v32 = vld [vmem:[%s1995_s0 + $0x38] sm:$0xff]   ;;  %35 = vst.msk [vmem:[#allocation2 + $0x48] sm:$0xff] %vm2000_vm0, %v1378_v33  ;;  %36 = vst.msk [vmem:[#allocation2 + $0x50] sm:$0xff] %vm2000_vm0, %v1378_v33 }
   0xc   :  { %1273 = vmatprep.subr.bf16.mxu0 %v1323_v3  ;;  %1303 = vmatprep.subr.bf16.mxu1 %v1323_v3  ;;  %37 = vst.msk [vmem:[#allocation2 + $0x58] sm:$0xff] %vm2000_vm0, %v1378_v33  ;;  %38 = vst.msk [vmem:[#allocation2 + $0x60] sm:$0xff] %vm2000_vm0, %v1378_v33  ;;  %v1577_v38 = vld [vmem:[%s1997_s3] ss:$0 sm:$0xff] }
   0xd   :  { %39 = vst.msk [vmem:[#allocation2 + $0x68] sm:$0xff] %vm2000_vm0, %v1378_v33  ;;  %40 = vst.msk [vmem:[#allocation2 + $0x70] sm:$0xff] %vm2000_vm0, %v1378_v33 }
   0xe   :  { %348 = vperm.xlu1 %1320, %v320_v11   ;;  %345 = vperm.xlu0 %1319, %v319_v12   ;;  %41 = vst.msk [vmem:[#allocation2 + $0x78] sm:$0xff] %vm2000_vm0, %v1378_v33  ;;  %42 = vst.msk [vmem:[#allocation3] sm:$0xff] %vm2000_vm0, %v1378_v33 }
   0xf   :  { %43 = vst.msk [vmem:[#allocation3 + $0x8] sm:$0xff] %vm2000_vm0, %v1378_v33  ;;  %45 = vst.msk [vmem:[#allocation3 + $0x18] sm:$0xff] %vm2000_vm0, %v1378_v33 }
  0x10   :  { %46 = vst.msk [vmem:[#allocation3 + $0x20] sm:$0xff] %vm2000_vm0, %v1378_v33  ;;  %47 = vst.msk [vmem:[#allocation3 + $0x28] sm:$0xff] %vm2000_vm0, %v1378_v33 }
  0x11   :  { %48 = vst.msk [vmem:[#allocation3 + $0x30] sm:$0xff] %vm2000_vm0, %v1378_v33  ;;  %49 = vst.msk [vmem:[#allocation3 + $0x38] sm:$0xff] %vm2000_vm0, %v1378_v33 }
  0x12   :  { %354 = vperm.xlu1 %1320, %v322_v14   ;;  %351 = vperm.xlu0 %1319, %v321_v15   ;;  %50 = vst.msk [vmem:[#allocation3 + $0x40] sm:$0xff] %vm2000_vm0, %v1378_v33  ;;  %51 = vst.msk [vmem:[#allocation3 + $0x48] sm:$0xff] %vm2000_vm0, %v1378_v33 }
  0x13   :  { %1274 = vmatpush3.bf16.xpose.msra.mxu0 %v1323_v3  ;;  %1311 = vmatpush3.bf16.xpose.msra.mxu1 %v1323_v3  ;;  %52 = vst.msk [vmem:[#allocation3 + $0x50] sm:$0xff] %vm2000_vm0, %v1378_v33  ;;  %53 = vst.msk [vmem:[#allocation3 + $0x58] sm:$0xff] %vm2000_vm0, %v1378_v33 }
  0x14   :  { %1275 = vmatprep.subr.bf16.mxu0 %v1324_v6  ;;  %1304 = vmatprep.subr.bf16.mxu1 %v1324_v6  ;;  %54 = vst.msk [vmem:[#allocation3 + $0x60] sm:$0xff] %vm2000_vm0, %v1378_v33  ;;  %55 = vst.msk [vmem:[#allocation3 + $0x68] sm:$0xff] %vm2000_vm0, %v1378_v33 }
  0x15   :  { %56 = vst.msk [vmem:[#allocation3 + $0x70] sm:$0xff] %vm2000_vm0, %v1378_v33  ;;  %57 = vst.msk [vmem:[#allocation3 + $0x78] sm:$0xff] %vm2000_vm0, %v1378_v33 }
  0x16   :  { %360 = vperm.xlu1 %1320, %v324_v16   ;;  %357 = vperm.xlu0 %1319, %v323_v17   ;;  %vm1586_vm5 = vmand %vm452_vm1, %vm466_vm2  ;;  %vm455_vm1 = vcmp.ne.s32.totalorder %v418_v58, %v1572_v37  ;;  %1202 = vst.msk [vmem:[%s1998_s5 + $0x10] sm:$0xff] %vm2000_vm0, %v1378_v33 }
  0x17   :  { %vm1596_vm7 = vmand %vm450_vm3, %vm466_vm2  ;;  %1203 = vst.msk [vmem:[%s1998_s5 + $0x18] sm:$0xff] %vm2000_vm0, %v1378_v33 }
  0x18   :  { %vm1624_vm13 = vmand %vm453_vm10, %vm466_vm2  ;;  %1204 = vst.msk [vmem:[%s1998_s5 + $0x20] sm:$0xff] %vm2000_vm0, %v1378_v33 }
  0x19   :  { %vm1638_vm15 = vmand %vm451_vm11, %vm466_vm2  ;;  %1205 = vst.msk [vmem:[%s1998_s5 + $0x28] sm:$0xff] %vm2000_vm0, %v1378_v33 }
  0x1a   :  { %366 = vperm.xlu1 %1320, %v326_v19   ;;  %363 = vperm.xlu0 %1319, %v325_v20   ;;  %v423_v19 = vadd.s32 80, %v1569_v35  ;;  %1206 = vst.msk [vmem:[%s1998_s5 + $0x30] sm:$0xff] %vm2000_vm0, %v1378_v33  ;;  %1207 = vst.msk [vmem:[%s1998_s5 + $0x38] sm:$0xff] %vm2000_vm0, %v1378_v33 }
  0x1b   :  { %1276 = vmatpush3.bf16.xpose.msra.mxu0 %v1324_v6  ;;  %1312 = vmatpush3.bf16.xpose.msra.mxu1 %v1324_v6  ;;  %1208 = vst.msk [vmem:[%s1998_s5 + $0x40] sm:$0xff] %vm2000_vm0, %v1378_v33  ;;  %1209 = vst.msk [vmem:[%s1998_s5 + $0x48] sm:$0xff] %vm2000_vm0, %v1378_v33 }
  0x1c   :  { %1277 = vmatprep.subr.bf16.mxu0 %v1325_v13  ;;  %1305 = vmatprep.subr.bf16.mxu1 %v1325_v13  ;;  %1210 = vst.msk [vmem:[%s1998_s5 + $0x50] sm:$0xff] %vm2000_vm0, %v1378_v33  ;;  %1211 = vst.msk [vmem:[%s1998_s5 + $0x58] sm:$0xff] %vm2000_vm0, %v1378_v33 }
  0x1d   :  { %1212 = vst.msk [vmem:[%s1998_s5 + $0x60] sm:$0xff] %vm2000_vm0, %v1378_v33  ;;  %1213 = vst.msk [vmem:[%s1998_s5 + $0x68] sm:$0xff] %vm2000_vm0, %v1378_v33 }
  0x1e   :  { %372 = vperm.xlu1 %1320, %v328_v21   ;;  %369 = vperm.xlu0 %1319, %v327_v22   ;;  %1214 = vst.msk [vmem:[%s1998_s5 + $0x70] sm:$0xff] %vm2000_vm0, %v1378_v33  ;;  %1215 = vst.msk [vmem:[%s1998_s5 + $0x78] sm:$0xff] %vm2000_vm0, %v1378_v33 }
  0x22   :  { %378 = vperm.xlu1 %1320, %v330_v24   ;;  %375 = vperm.xlu0 %1319, %v329_v25  }
  0x23   :  { %1278 = vmatpush3.bf16.xpose.msra.mxu0 %v1325_v13  ;;  %1313 = vmatpush3.bf16.xpose.msra.mxu1 %v1325_v13 }
  0x24   :  { %1279 = vmatprep.subr.bf16.mxu0 %v1326_v18  ;;  %1306 = vmatprep.subr.bf16.mxu1 %v1326_v18 }
  0x2b   :  { %1280 = vmatpush3.bf16.xpose.msra.mxu0 %v1326_v18  ;;  %1314 = vmatpush3.bf16.xpose.msra.mxu1 %v1326_v18 }
  0x2c   :  { %1281 = vmatprep.subr.bf16.mxu0 %v1327_v23  ;;  %1307 = vmatprep.subr.bf16.mxu1 %v1327_v23 }
  0x33   :  { %1282 = vmatpush3.bf16.xpose.msra.mxu0 %v1327_v23  ;;  %1315 = vmatpush3.bf16.xpose.msra.mxu1 %v1327_v23 }
  0x34   :  { %1283 = vmatprep.subr.bf16.mxu0 %v1328_v26  ;;  %1308 = vmatprep.subr.bf16.mxu1 %v1328_v26 }
  0x3b   :  { %1284 = vmatpush3.bf16.xpose.msra.mxu0 %v1328_v26  ;;  %1316 = vmatpush3.bf16.xpose.msra.mxu1 %v1328_v26 }
  0x42   :  { %1286 = vmatmul.mubr.bf16.vlgmr.msra.gmra.mxu0 %v1331_v27  ;;  %1294 = vmatmul.mubr.bf16.vlgmr.msra.gmra.mxu1 %v1332_v28  ;;  %v421_v28 = vadd.s32 64, %v1569_v35 }
  0x43   :  { %1289 = vmatprep.mubr.bf16.mxu0 %v1333_v29  ;;  %1297 = vmatprep.mubr.bf16.mxu1 %v1334_v30 }
  0x4a   :  { %1290 = vmatmul.mubr.bf16.gmra.mxu0 %v1335_v31  ;;  %1298 = vmatmul.mubr.bf16.gmra.mxu1 %v1336_v32 }
  0x81   :  { %v340_v39 = vpop.permute.xlu1 %339  ;;  %v334_v40 = vpop.permute.xlu0 %333 }
  0x82   :  { %vm386_vm4 = vcmp.eq.s32.totalorder %v340_v39, %v1577_v38  ;;  %vm384_vm6 = vcmp.eq.s32.totalorder %v334_v40, %v1577_v38  ;;  %v424_v39 = vadd.s32 88, %v1569_v35 }
  0x83   :  { %vm535_vm8 = vmand %vm386_vm4, %vm1586_vm5 }
  0x84   :  { %vm533_vm9 = vmand %vm384_vm6, %vm1596_vm7 }
  0x85   :  { %v337_v52 = vpop.permute.xlu0 %336  ;;  %v343_v59 = vpop.permute.xlu1 %342 }
  0x86   :  { %vm387_vm12 = vcmp.eq.s32.totalorder %v343_v59, %v1577_v38  ;;  %vm385_vm3 = vcmp.eq.s32.totalorder %v337_v52, %v1577_v38 }
  0x87   :  { %vm536_vm4 = vmand %vm387_vm12, %vm1624_vm13 }
  0x88   :  { %vm534_vm10 = vmand %vm385_vm3, %vm1638_vm15 }
  0x89   :  { %v346_v9 = vpop.permute.xlu0 %345  ;;  %v349_v17 = vpop.permute.xlu1 %348 }
  0x8a   :  { %vm388_vm6 = vcmp.eq.s32.totalorder %v346_v9, %v1577_v38  ;;  %vm389_vm11 = vcmp.eq.s32.totalorder %v349_v17, %v1577_v38 }
  0x8d   :  { %v355_v36 = vpop.permute.xlu1 %354 }
 0x102   :  { %v1287_v43 = vpop.f32.mrf.mxu0  ;;  %v1592_v44 = vpop.f32.mrf.mxu1 }
 0x103   :  { %v1238_v46 = vclamps-f32 %v1287_v43, 20.0  ;;  %v1246_v47 = vclamps-f32 %v1592_v44, 20.0  ;;  %v352_v43 = vpop.permute.xlu0 %351 }
 0x104   :  { %v220_v49 = vpop.f32.mrf.mxu0  ;;  %v1604_v50 = vpop.f32.mrf.mxu1 }
 0x105   :  { %v489_v53 = vmul.f32 1.442695, %v1238_v46  ;;  %v505_v54 = vmul.f32 1.442695, %v1246_v47  ;;  %v1236_v55 = vclamps-f32 %v220_v49, 20.0  ;;  %v551_v56 = vsel %vm535_vm8, %v1238_v46, 0.0  ;;  %vm1655_vm8 = vmand %vm454_vm14, %vm466_vm2 }
 0x106   :  { %v1288_v57 = vpop.f32.mrf.mxu0  ;;  %v1244_v61 = vclamps-f32 %v1604_v50, 20.0  ;;  %v1616_v62 = vpop.f32.mrf.mxu1  ;;  %666 = vadd.xlane.f32.xlu1 %v551_v56  ;;  %vm537_vm12 = vmand %vm388_vm6, %vm1655_vm8  ;;  %v419_v46 = vadd.s32 48, %v1569_v35  ;;  %vm457_vm6 = vcmp.ne.s32.totalorder %v420_v41, %v1572_v37 }
 0x107   :  { %1337 = vpow2.f32 %v489_v53  ;;  %v485_v60 = vmul.f32 1.442695, %v1236_v55  ;;  %v1239_v63 = vclamps-f32 %v1288_v57, 20.0  ;;  %v549_v0 = vsel %vm533_vm9, %v1236_v55, 0.0  ;;  %vm1662_vm9 = vmand %vm455_vm1, %vm466_vm2  ;;  %v361_v57 = vpop.permute.xlu1 %360 }
 0x108   :  { %1339 = vpow2.f32 %v505_v54  ;;  %v223_v1 = vpop.f32.mrf.mxu0  ;;  %v501_v3 = vmul.f32 1.442695, %v1244_v61  ;;  %662 = vadd.xlane.f32.xlu0 %v549_v0  ;;  %v1247_v5 = vclamps-f32 %v1616_v62, 20.0  ;;  %vm538_vm14 = vmand %vm389_vm11, %vm1662_vm9  ;;  %vm460_vm1 = vcmp.ne.s32.totalorder %v423_v19, %v1572_v37  ;;  %v1697_v31 = vpop.f32.mrf.mxu1  ;;  %v566_v62 = vld [vmem:[#allocation2 + $0x8] sm:$0xff] }
 0x109   :  { %1341 = vpow2.f32 %v485_v60  ;;  %v1237_v4 = vclamps-f32 %v223_v1, 20.0  ;;  %v491_v6 = vmul.f32 1.442695, %v1239_v63  ;;  %v552_v11 = vsel %vm536_vm4, %v1239_v63, 0.0  ;;  %vm1693_vm3 = vmand %vm460_vm1, %vm466_vm2  ;;  %v358_v60 = vpop.permute.xlu0 %357 }
 0x10a   :  { %v1632_v7 = vpop.f32.mrf.mxu0  ;;  %v507_v10 = vmul.f32 1.442695, %v1247_v5  ;;  %v1707_v48 = vpop.f32.mrf.mxu1  ;;  %v1245_v49 = vclamps-f32 %v1697_v31, 20.0  ;;  %vm461_vm4 = vcmp.ne.s32.totalorder %v424_v39, %v1572_v37  ;;  %vm459_vm11 = vcmp.ne.s32.totalorder %v422_v45, %v1572_v37 }
 0x10b   :  { %1343 = vpow2.f32 %v491_v6  ;;  %v487_v14 = vmul.f32 1.442695, %v1237_v4  ;;  %v550_v20 = vsel %vm534_vm10, %v1237_v4, 0.0  ;;  %v1242_v54 = vclamps-f32 %v1632_v7, 20.0  ;;  %vm1729_vm10 = vmand %vm461_vm4, %vm466_vm2  ;;  %v367_v8 = vpop.permute.xlu1 %366  ;;  %v649_v6 = vld [vmem:[#allocation3 + $0x18] sm:$0xff] }
 0x10c   :  { %v1651_v12 = vpop.f32.mrf.mxu0  ;;  %1345 = vpow2.f32 %v501_v3  ;;  %668 = vadd.xlane.f32.xlu0 %v552_v11  ;;  %v1725_v58 = vpop.f32.mrf.mxu1  ;;  %v503_v63 = vmul.f32 1.442695, %v1245_v49  ;;  %vm390_vm1 = vcmp.eq.s32.totalorder %v352_v43, %v1577_v38  ;;  %vm1757_vm4 = vmand %vm459_vm11, %vm466_vm2  ;;  %v1250_v9 = vclamps-f32 %v1707_v48, 20.0 }
 0x10d   :  { %v1240_v15 = vclamps-f32 %v1651_v12, 20.0  ;;  %1347 = vpow2.f32 %v507_v10  ;;  %v497_v3 = vmul.f32 1.442695, %v1242_v54  ;;  %v426_v19 = vadd.s32 104, %v1569_v35 }
 0x10e   :  { %v1666_v18 = vpop.f32.mrf.mxu0  ;;  %1349 = vpow2.f32 %v487_v14  ;;  %v1763_v10 = vpop.f32.mrf.mxu1  ;;  %v513_v17 = vmul.f32 1.442695, %v1250_v9  ;;  %v1248_v31 = vclamps-f32 %v1725_v58, 20.0 }
 0x10f   :  { %v553_v21 = vsel %vm537_vm12, %v1240_v15, 0.0  ;;  %vm391_vm12 = vcmp.eq.s32.totalorder %v355_v36, %v1577_v38  ;;  %v1243_v0 = vclamps-f32 %v1666_v18, 20.0  ;;  %1351 = vpow2.f32 %v503_v63 }
 0x110   :  { %v1680_v22 = vpop.f32.mrf.mxu0  ;;  %664 = vadd.xlane.f32.xlu0 %v550_v20  ;;  %670 = vadd.xlane.f32.xlu1 %v553_v21  ;;  %1353 = vpow2.f32 %v497_v3  ;;  %v364_v20 = vpop.permute.xlu0 %363  ;;  %v1251_v21 = vclamps-f32 %v1763_v10, 20.0 }
 0x111   :  { %v1241_v23 = vclamps-f32 %v1680_v22, 20.0  ;;  %v499_v11 = vmul.f32 1.442695, %v1243_v0 }
 0x112   :  { %v515_v33 = vmul.f32 1.442695, %v1251_v21 }
 0x113   :  { %v554_v24 = vsel %vm538_vm14, %v1241_v23, 0.0  ;;  %vm1742_vm14 = vmand %vm457_vm6, %vm466_vm2  ;;  %vm392_vm6 = vcmp.eq.s32.totalorder %v358_v60, %v1577_v38  ;;  %1355 = vpow2.f32 %v499_v11  ;;  %v495_v12 = vmul.f32 1.442695, %v1241_v23 }
 0x114   :  { %v1338_v25 = vpop.eup %1337  ;;  %672 = vadd.xlane.f32.xlu0 %v554_v24  ;;  %v425_v24 = vadd.s32 96, %v1569_v35  ;;  %1357 = vpow2.f32 %v513_v17  ;;  %v370_v50 = vpop.permute.xlu0 %369  ;;  %v427_v23 = vadd.s32 112, %v1569_v35 }
 0x115   :  { %v1340_v26 = vpop.eup %1339  ;;  %v519_v27 = vsel %vm1586_vm5, %v1338_v25, 0.0  ;;  %vm458_vm5 = vcmp.ne.s32.totalorder %v421_v28, %v1572_v37  ;;  %1359 = vpow2.f32 %v515_v33 }
 0x116   :  { %v1342_v29 = vpop.eup %1341  ;;  %585 = vadd.xlane.f32.xlu1 %v519_v27  ;;  %v527_v34 = vsel %vm1693_vm3, %v1340_v26, 0.0  ;;  %v493_v26 = vmul.f32 1.442695, %v1240_v15  ;;  %v271_v27 = vpop.f32.mrf.mxu1 }
 0x117   :  { %v517_v32 = vsel %vm1596_vm7, %v1342_v29, 0.0  ;;  %vm1715_vm7 = vmand %vm458_vm5, %vm466_vm2  ;;  %v373_v29 = vpop.permute.xlu1 %372 }
 0x118   :  { %v1344_v40 = vpop.eup %1343  ;;  %581 = vadd.xlane.f32.xlu0 %v517_v32  ;;  %v509_v32 = vmul.f32 1.442695, %v1248_v31  ;;  %1361 = vpow2.f32 %v493_v26  ;;  %v575_v26 = vld [vmem:[#allocation2 + $0x50] sm:$0xff] }
 0x119   :  { %v1346_v42 = vpop.eup %1345  ;;  %v520_v51 = vsel %vm1624_vm13, %v1344_v40, 0.0  ;;  %vm456_vm13 = vcmp.ne.s32.totalorder %v419_v46, %v1572_v37  ;;  %1363 = vpow2.f32 %v495_v12  ;;  %v428_v40 = vadd.s32 120, %v1569_v35 }
 0x11a   :  { %601 = vadd.xlane.f32.xlu1 %v527_v34  ;;  %v1348_v53 = vpop.eup %1347  ;;  %v525_v55 = vsel %vm1715_vm7, %v1346_v42, 0.0  ;;  %vm1751_vm5 = vmand %vm456_vm13, %vm466_vm2  ;;  %vm393_vm13 = vcmp.eq.s32.totalorder %v361_v57, %v1577_v38  ;;  %1365 = vpow2.f32 %v509_v32  ;;  %v376_v57 = vpop.permute.xlu0 %375 }
 0x11b   :  { %v1350_v56 = vpop.eup %1349  ;;  %v528_v1 = vsel %vm1729_vm10, %v1348_v53, 0.0  ;;  %vm539_vm11 = vmand %vm390_vm1, %vm1751_vm5  ;;  %vm394_vm1 = vcmp.eq.s32.totalorder %v364_v20, %v1577_v38 }
 0x11c   :  { %587 = vadd.xlane.f32.xlu0 %v520_v51  ;;  %v518_v4 = vsel %vm1638_vm15, %v1350_v56, 0.0  ;;  %vm540_vm15 = vmand %vm391_vm12, %vm1742_vm14  ;;  %v555_v18 = vsel %vm539_vm11, %v1242_v54, 0.0  ;;  %vm395_vm11 = vcmp.eq.s32.totalorder %v367_v8, %v1577_v38  ;;  %v1352_v44 = vpop.eup %1351  ;;  %v650_v8 = vld [vmem:[#allocation3 + $0x20] sm:$0xff] }
 0x11d   :  { %v556_v14 = vsel %vm540_vm15, %v1243_v0, 0.0  ;;  %vm541_vm12 = vmand %vm392_vm6, %vm1715_vm7  ;;  %vm463_vm7 = vcmp.ne.s32.totalorder %v426_v19, %v1572_v37  ;;  %v1354_v36 = vpop.eup %1353  ;;  %v526_v39 = vsel %vm1757_vm4, %v1352_v44, 0.0  ;;  %v648_v0 = vld [vmem:[#allocation3 + $0x10] sm:$0xff] }
 0x11e   :  { %597 = vadd.xlane.f32.xlu1 %v525_v55  ;;  %vm542_vm15 = vmand %vm393_vm13, %vm1757_vm4  ;;  %v557_v28 = vsel %vm541_vm12, %v1244_v61, 0.0  ;;  %vm462_vm13 = vcmp.ne.s32.totalorder %v425_v24, %v1572_v37  ;;  %v1249_v61 = vclamps-f32 %v271_v27, 20.0  ;;  %vm396_vm12 = vcmp.eq.s32.totalorder %v370_v50, %v1577_v38  ;;  %v567_v19 = vld [vmem:[#allocation2 + $0x10] sm:$0xff]  ;;  %v568_v50 = vld [vmem:[#allocation2 + $0x18] sm:$0xff] }
 0x11f   :  { %v558_v25 = vsel %vm542_vm15, %v1245_v49, 0.0  ;;  %vm543_vm6 = vmand %vm394_vm1, %vm1693_vm3  ;;  %vm397_vm15 = vcmp.eq.s32.totalorder %v373_v29, %v1577_v38  ;;  %v523_v42 = vsel %vm1751_vm5, %v1354_v36, 0.0  ;;  %vm465_vm4 = vcmp.ne.s32.totalorder %v428_v40, %v1572_v37 }
 0x120   :  { %603 = vadd.xlane.f32.xlu0 %v528_v1  ;;  %vm544_vm0 = vmand %vm395_vm11, %vm1729_vm10  ;;  %v559_v34 = vsel %vm543_vm6, %v1246_v47, 0.0  ;;  %v1356_v41 = vpop.eup %1355  ;;  %vm464_vm11 = vcmp.ne.s32.totalorder %v427_v23, %v1572_v37  ;;  %v379_v37 = vpop.permute.xlu1 %378  ;;  %v646_v1 = vld [vmem:[#allocation3] sm:$0xff]  ;;  %vm2033_vm6 = vcmask 7168  }
 0x121   :  { %v560_v15 = vsel %vm544_vm0, %v1247_v5, 0.0  ;;  %vm1883_vm3 = vmand %vm463_vm7, %vm466_vm2  ;;  %v511_v5 = vmul.f32 1.442695, %v1249_v61  ;;  %v1358_v43 = vpop.eup %1357  ;;  %v524_v46 = vsel %vm1742_vm14, %v1356_v41, 0.0  ;;  %vm399_vm14 = vcmp.eq.s32.totalorder %v379_v37, %v1577_v38  ;;  %v652_v41 = vld [vmem:[#allocation3 + $0x30] sm:$0xff] }
 0x122   :  { %583 = vadd.xlane.f32.xlu1 %v518_v4  ;;  %vm1894_vm10 = vmand %vm462_vm13, %vm466_vm2  ;;  %v1360_v35 = vpop.eup %1359 }
 0x123   :  { %vm546_vm0 = vmand %vm397_vm15, %vm1883_vm3  ;;  %1367 = vpow2.f32 %v511_v5 }
 0x124   :  { %676 = vadd.xlane.f32.xlu0 %v556_v14  ;;  %v562_v22 = vsel %vm546_vm0, %v1249_v61, 0.0  ;;  %vm545_vm1 = vmand %vm396_vm12, %vm1894_vm10  ;;  %v573_v61 = vld [vmem:[#allocation2 + $0x40] sm:$0xff] }
 0x125   :  { %v561_v47 = vsel %vm545_vm1, %v1248_v31, 0.0  ;;  %vm1915_vm7 = vmand %vm464_vm11, %vm466_vm2  ;;  %v1362_v51 = vpop.eup %1361 }
 0x126   :  { %674 = vadd.xlane.f32.xlu1 %v555_v18  ;;  %v531_v49 = vsel %vm1915_vm7, %v1358_v43, 0.0  ;;  %vm1924_vm5 = vmand %vm465_vm4, %vm466_vm2  ;;  %v1364_v54 = vpop.eup %1363  ;;  %v521_v55 = vsel %vm1655_vm8, %v1362_v51, 0.0  ;;  %vm398_vm2 = vcmp.eq.s32.totalorder %v376_v57, %v1577_v38  ;;  %v651_v18 = vld [vmem:[#allocation3 + $0x28] sm:$0xff]  ;;  %v654_v51 = vld [vmem:[#allocation3 + $0x40] sm:$0xff] }
 0x127   :  { %v532_v53 = vsel %vm1924_vm5, %v1360_v35, 0.0  ;;  %v1366_v56 = vpop.eup %1365  ;;  %v522_v58 = vsel %vm1662_vm9, %v1364_v54, 0.0  ;;  %vm547_vm8 = vmand %vm398_vm2, %vm1915_vm7  ;;  %v942_v57 = vld [vmem:[%s1999_s4 + $0x8] sm:$0xff] }
 0x128   :  { %680 = vadd.xlane.f32.xlu0 %v558_v25  ;;  %v529_v60 = vsel %vm1894_vm10, %v1366_v56, 0.0  ;;  %v563_v16 = vsel %vm547_vm8, %v1250_v9, 0.0  ;;  %vm548_vm9 = vmand %vm399_vm14, %vm1924_vm5  ;;  %v647_v9 = vld [vmem:[#allocation3 + $0x8] sm:$0xff]  ;;  %v565_v25 = vld [vmem:[#allocation2] sm:$0xff] }
 0x129   :  { %v564_v63 = vsel %vm548_vm9, %v1251_v21, 0.0  ;;  %vm2034_vm13 = vmmov %vm2033_vm6  ;;  %v657_v56 = vld [vmem:[#allocation3 + $0x58] sm:$0xff] }
 0x12a   :  { %678 = vadd.xlane.f32.xlu1 %v557_v28  ;;  %vm2035_vm15 = vmmov %vm2033_vm6 }
 0x12c   :  { %684 = vadd.xlane.f32.xlu0 %v560_v15 }
 0x12e   :  { %682 = vadd.xlane.f32.xlu1 %v559_v34  ;;  %v576_v34 = vld [vmem:[#allocation2 + $0x58] sm:$0xff] }
 0x130   :  { %688 = vadd.xlane.f32.xlu0 %v562_v22  ;;  %v1368_v59 = vpop.eup %1367 }
 0x131   :  { %v530_v13 = vsel %vm1883_vm3, %v1368_v59, 0.0  ;;  %vm2036_vm3 = vmmov %vm2033_vm6  ;;  %v656_v59 = vld [vmem:[#allocation3 + $0x50] sm:$0xff] }
 0x132   :  { %686 = vadd.xlane.f32.xlu1 %v561_v47  ;;  %vm2037_vm12 = vmmov %vm2036_vm3  ;;  %v941_v47 = vld [vmem:[%s1999_s4] sm:$0xff] }
 0x133   :  { %vm2038_vm10 = vmmov %vm2036_vm3  ;;  %v1069_v43 = vadd.f32 1e-08, %v941_v47 }
 0x134   :  { %599 = vadd.xlane.f32.xlu0 %v526_v39  ;;  %vm2039_vm0 = vmmov %vm2036_vm3  ;;  %v653_v39 = vld [vmem:[#allocation3 + $0x38] sm:$0xff] }
 0x135   :  { %vm2040_vm1 = vmmov %vm2039_vm0 }
 0x136   :  { %593 = vadd.xlane.f32.xlu1 %v523_v42  ;;  %vm2041_vm11 = vmmov %vm2039_vm0 }
 0x137   :  { %vm2042_vm7 = vmmov %vm2039_vm0 }
 0x138   :  { %595 = vadd.xlane.f32.xlu0 %v524_v46  ;;  %vm2043_vm4 = vmmov %vm2039_vm0 }
 0x139   :  { %vm2044_vm5 = vmmov %vm2039_vm0 }
 0x13a   :  { %609 = vadd.xlane.f32.xlu1 %v531_v49  ;;  %vm2045_vm2 = vmmov %vm2039_vm0  ;;  %v655_v49 = vld [vmem:[#allocation3 + $0x48] sm:$0xff] }
 0x13b   :  { %vm2046_vm14 = vmmov %vm2039_vm0 }
 0x13c   :  { %611 = vadd.xlane.f32.xlu0 %v532_v53  ;;  %vm2047_vm8 = vmmov %vm2039_vm0 }
 0x13d   :  { %vm2048_vm9 = vmmov %vm2039_vm0 }
 0x13e   :  { %589 = vadd.xlane.f32.xlu1 %v521_v55 }
 0x140   :  { %591 = vadd.xlane.f32.xlu0 %v522_v58 }
 0x142   :  { %605 = vadd.xlane.f32.xlu1 %v529_v60 }
 0x144   :  { %607 = vadd.xlane.f32.xlu0 %v530_v13 }
 0x146   :  { %690 = vadd.xlane.f32.xlu1 %v563_v16 }
 0x148   :  { %692 = vadd.xlane.f32.xlu0 %v564_v63  ;;  %v1070_v63 = vadd.f32 1e-08, %v942_v57 }
 0x18f   :  { %v667_v38 = vpop.xlane.xlu1 %666 }
 0x190   :  { %v696_v2 = vadd.f32 %v667_v38, %v648_v0  ;;  %v659_v38 = vld [vmem:[#allocation3 + $0x68] sm:$0xff] }
 0x191   :  { %v663_v3 = vpop.xlane.xlu0 %662 }
 0x192   :  { %712 = vst.msk [vmem:[#allocation3 + $0x10] sm:$0xff] %vm2033_vm6, %v696_v2  ;;  %v694_v4 = vadd.f32 %v663_v3, %v646_v1  ;;  %vm2049_vm6 = vmmov %vm2039_vm0  ;;  %v658_v1 = vld [vmem:[#allocation3 + $0x60] sm:$0xff] }
 0x194   :  { %710 = vst.msk [vmem:[#allocation3] sm:$0xff] %vm2034_vm13, %v694_v4  ;;  %vm2050_vm13 = vmmov %vm2039_vm0 }
 0x195   :  { %v669_v48 = vpop.xlane.xlu0 %668 }
 0x196   :  { %v697_v7 = vadd.f32 %v669_v48, %v649_v6 }
 0x198   :  { %713 = vst.msk [vmem:[#allocation3 + $0x18] sm:$0xff] %vm2035_vm15, %v697_v7  ;;  %vm2051_vm15 = vmmov %vm2039_vm0  ;;  %v574_v7 = vld [vmem:[#allocation2 + $0x48] sm:$0xff] }
 0x199   :  { %v665_v10 = vpop.xlane.xlu0 %664  ;;  %v671_v11 = vpop.xlane.xlu1 %670 }
 0x19a   :  { %v695_v14 = vadd.f32 %v665_v10, %v647_v9  ;;  %v698_v17 = vadd.f32 %v671_v11, %v650_v8  ;;  %v571_v8 = vld [vmem:[#allocation2 + $0x30] sm:$0xff] }
 0x19c   :  { %711 = vst.msk [vmem:[#allocation3 + $0x8] sm:$0xff] %vm2036_vm3, %v695_v14  ;;  %vm2052_vm3 = vmmov %vm2039_vm0 }
 0x19d   :  { %714 = vst.msk [vmem:[#allocation3 + $0x20] sm:$0xff] %vm2037_vm12, %v698_v17  ;;  %v673_v20 = vpop.xlane.xlu0 %672  ;;  %vm2053_vm12 = vmmov %vm2039_vm0 }
 0x19e   :  { %v699_v21 = vadd.f32 %v673_v20, %v651_v18 }
 0x19f   :  { %v586_v24 = vpop.xlane.xlu1 %585 }
 0x1a0   :  { %v615_v33 = vadd.f32 %v586_v24, %v567_v19  ;;  %715 = vst.msk [vmem:[#allocation3 + $0x28] sm:$0xff] %vm2038_vm10, %v699_v21  ;;  %v1021_v19 = vld [vmem:[#allocation3] sm:$0xff]  ;;  %v572_v21 = vld [vmem:[#allocation2 + $0x38] sm:$0xff]  ;;  %vm2054_vm10 = vmmov %vm2039_vm0 }
 0x1a1   :  { %v582_v27 = vpop.xlane.xlu0 %581 }
 0x1a2   :  { %632 = vst.msk [vmem:[#allocation2 + $0x10] sm:$0xff] %vm2039_vm0, %v615_v33  ;;  %v613_v28 = vadd.f32 %v582_v27, %v565_v25  ;;  %v579_v33 = vld [vmem:[#allocation2 + $0x70] sm:$0xff] }
 0x1a3   :  { %v602_v29 = vpop.xlane.xlu1 %601 }
 0x1a4   :  { %v623_v31 = vadd.f32 %v602_v29, %v575_v26  ;;  %630 = vst.msk [vmem:[#allocation2] sm:$0xff] %vm2040_vm1, %v613_v28  ;;  %vm2055_vm1 = vmmov %vm2039_vm0 }
 0x1a5   :  { %v588_v12 = vpop.xlane.xlu0 %587 }
 0x1a6   :  { %640 = vst.msk [vmem:[#allocation2 + $0x50] sm:$0xff] %vm2041_vm11, %v623_v31  ;;  %v616_v15 = vadd.f32 %v588_v12, %v568_v50  ;;  %v580_v31 = vld [vmem:[#allocation2 + $0x78] sm:$0xff]  ;;  %v569_v12 = vld [vmem:[#allocation2 + $0x20] sm:$0xff]  ;;  %vm2056_vm11 = vmmov %vm2039_vm0 }
 0x1a7   :  { %v598_v30 = vpop.xlane.xlu1 %597 }
 0x1a8   :  { %v621_v32 = vadd.f32 %v598_v30, %v573_v61  ;;  %633 = vst.msk [vmem:[#allocation2 + $0x18] sm:$0xff] %vm2042_vm7, %v616_v15  ;;  %vm2057_vm7 = vmmov %vm2039_vm0 }
 0x1a9   :  { %v604_v5 = vpop.xlane.xlu0 %603 }
 0x1aa   :  { %638 = vst.msk [vmem:[#allocation2 + $0x40] sm:$0xff] %vm2043_vm4, %v621_v32  ;;  %v624_v22 = vadd.f32 %v604_v5, %v576_v34  ;;  %vm2058_vm4 = vmmov %vm2039_vm0 }
 0x1ab   :  { %v584_v44 = vpop.xlane.xlu1 %583  ;;  %v957_v23 = vld [vmem:[#allocation2] sm:$0xff] }
 0x1ac   :  { %v614_v36 = vadd.f32 %v584_v44, %v566_v62  ;;  %v973_v40 = vadd.f32 1e-08, %v957_v23  ;;  %641 = vst.msk [vmem:[#allocation2 + $0x58] sm:$0xff] %vm2044_vm5, %v624_v22  ;;  %v570_v22 = vld [vmem:[#allocation2 + $0x28] sm:$0xff]  ;;  %v577_v23 = vld [vmem:[#allocation2 + $0x60] sm:$0xff]  ;;  %vm2059_vm5 = vmmov %vm2039_vm0 }
 0x1ad   :  { %v677_v42 = vpop.xlane.xlu0 %676 }
 0x1ae   :  { %631 = vst.msk [vmem:[#allocation2 + $0x8] sm:$0xff] %vm2045_vm2, %v614_v36  ;;  %1369 = vlog2.f32 %v973_v40  ;;  %v701_v46 = vadd.f32 %v677_v42, %v653_v39  ;;  %vm2060_vm2 = vmmov %vm2039_vm0 }
 0x1af   :  { %v675_v45 = vpop.xlane.xlu1 %674  ;;  %1371 = vrcp.f32 %v1069_v43 }
 0x1b0   :  { %v700_v35 = vadd.f32 %v675_v45, %v652_v41  ;;  %717 = vst.msk [vmem:[#allocation3 + $0x38] sm:$0xff] %vm2046_vm14, %v701_v46  ;;  %v578_v46 = vld [vmem:[#allocation2 + $0x68] sm:$0xff]  ;;  %v660_v45 = vld [vmem:[#allocation3 + $0x70] sm:$0xff]  ;;  %vm2061_vm14 = vmmov %vm2039_vm0 }
 0x1b1   :  { %v681_v52 = vpop.xlane.xlu0 %680 }
 0x1b2   :  { %716 = vst.msk [vmem:[#allocation3 + $0x30] sm:$0xff] %vm2047_vm8, %v700_v35  ;;  %v703_v53 = vadd.f32 %v681_v52, %v655_v49  ;;  %vm2062_vm8 = vmmov %vm2039_vm0 }
 0x1b3   :  { %v679_v54 = vpop.xlane.xlu1 %678 }
 0x1b4   :  { %v702_v55 = vadd.f32 %v679_v54, %v654_v51  ;;  %719 = vst.msk [vmem:[#allocation3 + $0x48] sm:$0xff] %vm2048_vm9, %v703_v53  ;;  %v661_v54 = vld [vmem:[#allocation3 + $0x78] sm:$0xff]  ;;  %vm2063_vm9 = vmmov %vm2039_vm0 }
 0x1b5   :  { %v958_v58 = vld [vmem:[#allocation2 + $0x8] sm:$0xff]  ;;  %v685_v60 = vpop.xlane.xlu0 %684 }
 0x1b6   :  { %v974_v37 = vadd.f32 1e-08, %v958_v58  ;;  %718 = vst.msk [vmem:[#allocation3 + $0x40] sm:$0xff] %vm2049_vm6, %v702_v55  ;;  %v705_v13 = vadd.f32 %v685_v60, %v657_v56  ;;  %vm2064_vm6 = vmmov %vm2039_vm0 }
 0x1b7   :  { %v683_v16 = vpop.xlane.xlu1 %682 }
 0x1b8   :  { %1373 = vlog2.f32 %v974_v37  ;;  %v704_v0 = vadd.f32 %v683_v16, %v656_v59  ;;  %721 = vst.msk [vmem:[#allocation3 + $0x58] sm:$0xff] %vm2050_vm13, %v705_v13  ;;  %vm2065_vm13 = vmmov %vm2039_vm0 }
 0x1b9   :  { %v689_v2 = vpop.xlane.xlu0 %688  ;;  %1375 = vrcp.f32 %v1070_v63 }
 0x1ba   :  { %720 = vst.msk [vmem:[#allocation3 + $0x50] sm:$0xff] %vm2051_vm15, %v704_v0  ;;  %v707_v3 = vadd.f32 %v689_v2, %v659_v38 }
 0x1bb   :  { %v687_v4 = vpop.xlane.xlu1 %686  ;;  %v1370_v6 = vpop.eup %1369 }
 0x1bc   :  { %v706_v48 = vadd.f32 %v687_v4, %v658_v1  ;;  %v990_v9 = vmul.f32 0.6931472, %v1370_v6  ;;  %723 = vst.msk [vmem:[#allocation3 + $0x68] sm:$0xff] %vm2052_vm3, %v707_v3  ;;  %v1372_v18 = vpop.eup %1371 }
 0x1bd   :  { %v600_v10 = vpop.xlane.xlu0 %599 }
 0x1be   :  { %722 = vst.msk [vmem:[#allocation3 + $0x60] sm:$0xff] %vm2053_vm12, %v706_v48  ;;  %v1037_v11 = vmul.f32 %v990_v9, %v941_v47  ;;  %v622_v14 = vadd.f32 %v600_v10, %v574_v7  ;;  %v1022_v47 = vld [vmem:[#allocation3 + $0x8] sm:$0xff] }
 0x1bf   :  { %v594_v17 = vpop.xlane.xlu1 %593 }
 0x1c0   :  { %v619_v20 = vadd.f32 %v594_v17, %v571_v8  ;;  %v1053_v24 = vsub.f32 %v1021_v19, %v1037_v11  ;;  %639 = vst.msk [vmem:[#allocation2 + $0x48] sm:$0xff] %vm2054_vm10, %v622_v14 }
 0x1c1   :  { %v596_v25 = vpop.xlane.xlu0 %595 }
 0x1c2   :  { %636 = vst.msk [vmem:[#allocation2 + $0x30] sm:$0xff] %vm2039_vm0, %v619_v20  ;;  %v1086_v26 = vmul.f32 %v1372_v18, %v1053_v24  ;;  %v620_v27 = vadd.f32 %v596_v25, %v572_v21 }
 0x1c3   :  { %v610_v28 = vpop.xlane.xlu1 %609 }
 0x1c4   :  { %v627_v29 = vadd.f32 %v610_v28, %v579_v33  ;;  %v1117_v61 = vmul.f32 -1.0, %v1086_v26  ;;  %637 = vst.msk [vmem:[#allocation2 + $0x38] sm:$0xff] %vm2055_vm1, %v620_v27 }
 0x1c5   :  { %v1374_v50 = vpop.eup %1373  ;;  %v612_v30 = vpop.xlane.xlu0 %611 }
 0x1c6   :  { %v992_v15 = vmul.f32 0.6931472, %v1374_v50  ;;  %644 = vst.msk [vmem:[#allocation2 + $0x70] sm:$0xff] %vm2056_vm11, %v627_v29  ;;  %v628_v32 = vadd.f32 %v612_v30, %v580_v31  ;;  %v1376_v44 = vpop.eup %1375 }
 0x1c7   :  { %1200 = vst.msk [vmem:[%s1998_s5] sm:$0xff] %vm2057_vm7, %v1117_v61  ;;  %v590_v34 = vpop.xlane.xlu1 %589 }
 0x1c8   :  { %v1038_v62 = vmul.f32 %v992_v15, %v942_v57  ;;  %v617_v5 = vadd.f32 %v590_v34, %v569_v12  ;;  %645 = vst.msk [vmem:[#allocation2 + $0x78] sm:$0xff] %vm2058_vm4, %v628_v32 }
 0x1c9   :  { %v592_v39 = vpop.xlane.xlu0 %591 }
 0x1ca   :  { %v1054_v36 = vsub.f32 %v1022_v47, %v1038_v62  ;;  %634 = vst.msk [vmem:[#allocation2 + $0x20] sm:$0xff] %vm2059_vm5, %v617_v5  ;;  %v618_v40 = vadd.f32 %v592_v39, %v570_v22 }
 0x1cb   :  { %v606_v41 = vpop.xlane.xlu1 %605 }
 0x1cc   :  { %v1088_v42 = vmul.f32 %v1376_v44, %v1054_v36  ;;  %v625_v43 = vadd.f32 %v606_v41, %v577_v23  ;;  %635 = vst.msk [vmem:[#allocation2 + $0x28] sm:$0xff] %vm2060_vm2, %v618_v40 }
 0x1cd   :  { %v608_v49 = vpop.xlane.xlu0 %607 }
 0x1ce   :  { %v1118_v35 = vmul.f32 -1.0, %v1088_v42  ;;  %642 = vst.msk [vmem:[#allocation2 + $0x60] sm:$0xff] %vm2061_vm14, %v625_v43  ;;  %v626_v51 = vadd.f32 %v608_v49, %v578_v46 }
 0x1cf   :  { %v691_v52 = vpop.xlane.xlu1 %690 }
 0x1d0   :  { %1201 = vst.msk [vmem:[%s1998_s5 + $0x8] sm:$0xff] %vm2062_vm8, %v1118_v35  ;;  %v708_v53 = vadd.f32 %v691_v52, %v660_v45 }
 0x1d1   :  { %643 = vst.msk [vmem:[#allocation2 + $0x68] sm:$0xff] %vm2063_vm9, %v626_v51  ;;  %v693_v55 = vpop.xlane.xlu0 %692 }
 0x1d2   :  { %724 = vst.msk [vmem:[#allocation3 + $0x70] sm:$0xff] %vm2064_vm6, %v708_v53  ;;  %v709_v56 = vadd.f32 %v693_v55, %v661_v54 }
 0x1d4   :  { %725 = vst.msk [vmem:[#allocation3 + $0x78] sm:$0xff] %vm2065_vm13, %v709_v56 }

</bundles_post_ra>
